<compile_context>
chip_gen: v7x
topology: tpu7x:2x2x1
jax: 0.10.0
libtpu: 0.0.40
codegen_flags: <defaults>
</compile_context>

<pallas_src>
import functools
from math import sqrt

import jax
import jax.numpy as jnp
from jax import lax
from jax.experimental import pallas as pl
from jax.experimental.pallas import tpu as pltpu

_LANE = 128   # lane width (last-dim tiling unit)
_SUB = 8      # sublane width (second-to-last-dim tiling unit)


def _round_up(a, b):
    return (a + b - 1) // b * b


def _flash_tile():
    """Generation-aware q/kv tile for the flash path (re-derived for VMEM size)."""
    try:
        vmem = pltpu.get_tpu_info().vmem_capacity_bytes
    except Exception:
        return 256
    # v5e/v6e: 128 MiB per TC -> bigger tiles amortize per-step overhead.
    # v7x: 64 MiB per TC -> keep tiles in the 256 range.
    return 512 if vmem >= (96 << 20) else 256


# ----------------------------------------------------------------------------
# Path A: small N — single resident block (no grid, no per-step overhead).
# ----------------------------------------------------------------------------
def _resident_kernel(x_ref, w_ref, b_ref, o_ref, *, norm_fact, n, sec_k, sec_v):
    x = x_ref[...]

    # Fused Q|K|V projection: one wide MXU matmul instead of three narrow ones.
    qkv = jnp.dot(x, w_ref[...], preferred_element_type=jnp.float32) + b_ref[...]
    q = qkv[:, 0:sec_k]                       # (n_pad, sec_k); pad lanes are 0
    k = qkv[:, sec_k:2 * sec_k]               # (n_pad, sec_k); pad lanes are 0
    v = qkv[:, 2 * sec_k:2 * sec_k + sec_v]   # (n_pad, sec_v); pad lanes are 0

    # scores = Q @ K^T without an explicit in-kernel transpose: contract on the
    # shared feature axis so Mosaic feeds the MXU directly (no XLU vxpose).
    scores = lax.dot_general(
        q, k, dimension_numbers=(((1,), (1,)), ((), ())),
        preferred_element_type=jnp.float32)   # (n_pad, n_pad)

    n_pad = scores.shape[0]
    if n_pad > n:  # static branch: only emitted when rows were padded
        # Padded rows of x produce bias-only keys; mask those key columns out.
        col = lax.broadcasted_iota(jnp.int32, scores.shape, 1)
        scores = jnp.where(col < n, scores, -jnp.inf)

    # Row softmax (dim=1), kept UNnormalized here — the normalization and the
    # 1/sqrt(dim_k) scale are folded into the small (n, dim_v) output instead
    # of the (n, n) score matrix.
    m = jnp.max(scores, axis=1, keepdims=True)
    e = jnp.exp(scores - m)
    denom = jnp.sum(e, axis=1, keepdims=True)

    num = jnp.dot(e, v, preferred_element_type=jnp.float32)   # (n_pad, sec_v)

    # EUP approximate reciprocal (free VLIW slot) + one Newton step (~f32 acc).
    inv = pl.reciprocal(denom, approx=True)
    inv = inv * (2.0 - denom * inv)

    o_ref[...] = (num * (norm_fact * inv)).astype(o_ref.dtype)


def _attention_resident(x, w_fused, b_fused, *, norm_fact, n, d, sec_k, sec_v):
    n_pad = _round_up(n, _SUB)
    x_pad = x if n_pad == n else jnp.pad(x, ((0, n_pad - n), (0, 0)))
    width = w_fused.shape[1]

    kernel = functools.partial(_resident_kernel, norm_fact=norm_fact, n=n,
                               sec_k=sec_k, sec_v=sec_v)
    full = lambda shape: pl.BlockSpec(shape, lambda: (0,) * len(shape))

    return pl.pallas_call(
        kernel,
        out_shape=jax.ShapeDtypeStruct((n_pad, sec_v), x.dtype),
        in_specs=[
            full((n_pad, d)),      # x (row-padded)
            full((d, width)),      # fused Wq^T|Wk^T|Wv^T (lane-padded)
            full((1, width)),      # fused bias row
        ],
        out_specs=full((n_pad, sec_v)),
    )(x_pad, w_fused, b_fused)


# ----------------------------------------------------------------------------
# Path B: large N — flash-style online softmax over a (query, kv) grid.
#   query axis: "parallel" (megacore on v7x), kv axis: "arbitrary" reduction.
# ----------------------------------------------------------------------------
def _flash_kernel(xq_ref, xkv_ref, w_ref, b_ref, o_ref,
                  q_sc, m_sc, l_sc, acc_sc, *,
                  norm_fact, n, sec_k, sec_v, tk):
    ki = pl.program_id(1)

    @pl.when(ki == 0)
    def _():
        # Project this query tile ONCE (cached in scratch across kv steps).
        q_sc[...] = (jnp.dot(xq_ref[...], w_ref[:, 0:sec_k],
                             preferred_element_type=jnp.float32)
                     + b_ref[:, 0:sec_k])
        m_sc[...] = jnp.full_like(m_sc, -jnp.inf)
        l_sc[...] = jnp.zeros_like(l_sc)
        acc_sc[...] = jnp.zeros_like(acc_sc)

    # Project this K|V tile (fused, lane-aligned slice of the packed weights).
    # TODO(synk): for bf16 inputs feed the score / p@v MXU ops in bf16 with
    # preferred_element_type=f32 (keep max/exp/reciprocal f32).
    kv = (jnp.dot(xkv_ref[...], w_ref[:, sec_k:2 * sec_k + sec_v],
                  preferred_element_type=jnp.float32)
          + b_ref[:, sec_k:2 * sec_k + sec_v])
    k = kv[:, 0:sec_k]
    v = kv[:, sec_k:sec_k + sec_v]

    # Transpose-free Q @ K^T (contract on the shared feature axis).
    s = lax.dot_general(q_sc[...], k, (((1,), (1,)), ((), ())),
                        preferred_element_type=jnp.float32)      # (tq, tk)

    # Mask padded key columns (x rows beyond n). Every row always keeps >= 1
    # finite entry (the first kv tile is never fully padded), so no NaNs.
    col = ki * tk + lax.broadcasted_iota(jnp.int32, s.shape, 1)
    s = jnp.where(col < n, s, -jnp.inf)

    m_prev = m_sc[...]
    m_new = jnp.maximum(m_prev, s.max(axis=1, keepdims=True))
    alpha = jnp.exp(m_prev - m_new)
    p = jnp.exp(s - m_new)
    l_sc[...] = alpha * l_sc[...] + p.sum(axis=1, keepdims=True)
    acc_sc[...] = alpha * acc_sc[...] + jnp.dot(
        p, v, preferred_element_type=jnp.float32)
    m_sc[...] = m_new

    @pl.when(ki == pl.num_programs(1) - 1)
    def _():
        denom = l_sc[...]
        inv = pl.reciprocal(denom, approx=True)
        inv = inv * (2.0 - denom * inv)
        o_ref[...] = (acc_sc[...] * (norm_fact * inv)).astype(o_ref.dtype)


def _attention_flash(x, w_fused, b_fused, *, norm_fact, n, d, sec_k, sec_v, tile):
    n_pad = _round_up(n, tile)
    x_pad = x if n_pad == n else jnp.pad(x, ((0, n_pad - n), (0, 0)))
    width = w_fused.shape[1]
    nt = n_pad // tile

    kernel = functools.partial(_flash_kernel, norm_fact=norm_fact, n=n,
                               sec_k=sec_k, sec_v=sec_v, tk=tile)

    grid_spec = pltpu.PrefetchScalarGridSpec(
        num_scalar_prefetch=0,
        grid=(nt, nt),
        in_specs=[
            pl.BlockSpec((tile, d), lambda qi, ki: (qi, 0)),   # x rows for Q
            pl.BlockSpec((tile, d), lambda qi, ki: (ki, 0)),   # x rows for K/V
            pl.BlockSpec((d, width), lambda qi, ki: (0, 0)),   # packed weights
            pl.BlockSpec((1, width), lambda qi, ki: (0, 0)),   # packed bias
        ],
        out_specs=pl.BlockSpec((tile, sec_v), lambda qi, ki: (qi, 0)),
        scratch_shapes=[
            pltpu.VMEM((tile, sec_k), jnp.float32),   # cached Q tile
            pltpu.VMEM((tile, 1), jnp.float32),       # running max
            pltpu.VMEM((tile, 1), jnp.float32),       # running denom
            pltpu.VMEM((tile, sec_v), jnp.float32),   # output accumulator
        ],
    )

    return pl.pallas_call(
        kernel,
        out_shape=jax.ShapeDtypeStruct((n_pad, sec_v), x.dtype),
        grid_spec=grid_spec,
        compiler_params=pltpu.CompilerParams(
            dimension_semantics=("parallel", "arbitrary")),
    )(x_pad, x_pad, w_fused, b_fused)


# ----------------------------------------------------------------------------
# Public wrapper: pack weights once at init, return a jitted fn of x.
# ----------------------------------------------------------------------------
def make_self_attention(wq, bq, wk, bk, wv, bv):
    """wq/wk: (dim_k, D); wv: (dim_v, D); biases: (dim,). Returns f(x)->(N, dim_v)."""
    dim_k, d = wq.shape
    dim_v = wv.shape[0]
    norm_fact = 1.0 / sqrt(dim_k)

    # Per-section lane padding (V does not inherit Q/K padding and vice versa).
    sec_k = _round_up(dim_k, _LANE)
    sec_v = _round_up(dim_v, _LANE)
    width = 2 * sec_k + sec_v

    # Packed once at init; zero padding keeps q.k^T and p@v exact.
    dtype = wq.dtype
    w_fused = jnp.zeros((d, width), dtype=dtype)
    w_fused = w_fused.at[:, 0:dim_k].set(wq.T)
    w_fused = w_fused.at[:, sec_k:sec_k + dim_k].set(wk.T)
    w_fused = w_fused.at[:, 2 * sec_k:2 * sec_k + dim_v].set(wv.T)

    b_fused = jnp.zeros((1, width), dtype=dtype)
    b_fused = b_fused.at[:, 0:dim_k].set(bq.reshape(1, dim_k))
    b_fused = b_fused.at[:, sec_k:sec_k + dim_k].set(bk.reshape(1, dim_k))
    b_fused = b_fused.at[:, 2 * sec_k:2 * sec_k + dim_v].set(bv.reshape(1, dim_v))

    w_fused = jax.device_put(w_fused)
    b_fused = jax.device_put(b_fused)

    @jax.jit
    def apply(x):
        n, d_in = x.shape
        assert d_in == d
        tile = _flash_tile()
        if n <= tile:
            out = _attention_resident(x, w_fused, b_fused, norm_fact=norm_fact,
                                      n=n, d=d, sec_k=sec_k, sec_v=sec_v)
        else:
            out = _attention_flash(x, w_fused, b_fused, norm_fact=norm_fact,
                                   n=n, d=d, sec_k=sec_k, sec_v=sec_v, tile=tile)
        return out[:n, :dim_v]

    return apply


def self_attention_ref(x, wq, bq, wk, bk, wv, bv):
    """Pure-JAX reference mirroring the PyTorch forward."""
    dim_k = wq.shape[0]
    q = x @ wq.T + bq
    k = x @ wk.T + bk
    v = x @ wv.T + bv
    scores = q @ k.T
    atten = jax.nn.softmax(scores, axis=1) * (1.0 / sqrt(dim_k))
    return atten @ v


if __name__ == "__main__":
    # Shapes consistent with the module: x: (seq=8, input_dim=32), dim_k=16, dim_v=32.
    N, INPUT_DIM, DIM_K, DIM_V = 8, 32, 16, 32

    key = jax.random.PRNGKey(0)
    kx, kq, kbq, kk, kbk, kv, kbv, kx2 = jax.random.split(key, 8)

    # nn.Linear-shaped parameters (weight: (out, in), bias: (out,)).
    bound = 1.0 / sqrt(INPUT_DIM)
    wq = jax.random.uniform(kq, (DIM_K, INPUT_DIM), jnp.float32, -bound, bound)
    bq = jax.random.uniform(kbq, (DIM_K,), jnp.float32, -bound, bound)
    wk = jax.random.uniform(kk, (DIM_K, INPUT_DIM), jnp.float32, -bound, bound)
    bk = jax.random.uniform(kbk, (DIM_K,), jnp.float32, -bound, bound)
    wv = jax.random.uniform(kv, (DIM_V, INPUT_DIM), jnp.float32, -bound, bound)
    bv = jax.random.uniform(kbv, (DIM_V,), jnp.float32, -bound, bound)

    attn = make_self_attention(wq, bq, wk, bk, wv, bv)   # packs weights once

    # Toy size -> resident single-block path.
    x = jax.random.normal(kx, (N, INPUT_DIM), dtype=jnp.float32)
    out = jax.block_until_ready(attn(x))
    ref = self_attention_ref(x, wq, bq, wk, bk, wv, bv)
    assert out.shape == (N, DIM_V)
    assert jnp.allclose(out, ref, atol=1e-5, rtol=1e-5), (
        f"resident path: max abs err {jnp.max(jnp.abs(out - ref))}")

    # Larger sequence -> flash (gridded online-softmax) path.
    N2 = 640
    x2 = jax.random.normal(kx2, (N2, INPUT_DIM), dtype=jnp.float32)
    out2 = jax.block_until_ready(attn(x2))
    ref2 = self_attention_ref(x2, wq, bq, wk, bk, wv, bv)
    assert out2.shape == (N2, DIM_V)
    assert jnp.allclose(out2, ref2, atol=1e-4, rtol=1e-4), (
        f"flash path: max abs err {jnp.max(jnp.abs(out2 - ref2))}")

    print("KERNEL_OK")
</pallas_src>

<mosaic_0001>
module attributes {stable_mosaic.version = 11 : i64} {
  func.func @_resident_kernel(%arg0: memref<8x32xf32, #tpu.memory_space<vmem>>, %arg1: memref<32x384xf32, #tpu.memory_space<vmem>>, %arg2: memref<1x384xf32, #tpu.memory_space<vmem>>, %arg3: memref<8x128xf32, #tpu.memory_space<vmem>>) attributes {dimension_semantics = [], scalar_prefetch = 0 : i64, scratch_operands = 0 : i64, tpu.core_type = #tpu.core_type<tc>} {
    %c0 = arith.constant 0 : index
    %c0_0 = arith.constant 0 : index
    %0 = vector.load %arg0[%c0, %c0_0] : memref<8x32xf32, #tpu.memory_space<vmem>>, vector<8x32xf32>
    %c0_1 = arith.constant 0 : index
    %c0_2 = arith.constant 0 : index
    %1 = vector.load %arg1[%c0_1, %c0_2] : memref<32x384xf32, #tpu.memory_space<vmem>>, vector<32x384xf32>
    %cst = arith.constant dense<0.000000e+00> : vector<8x384xf32>
    %2 = tpu.matmul %0, %1, %cst {dimension_numbers = #tpu.dot_dimension_numbers<[1], [0], [0], [1], [0, 0, 1, 1], [], []>} : vector<8x32xf32>, vector<32x384xf32>, vector<8x384xf32> -> vector<8x384xf32>
    %c0_3 = arith.constant 0 : index
    %c0_4 = arith.constant 0 : index
    %3 = vector.load %arg2[%c0_3, %c0_4] : memref<1x384xf32, #tpu.memory_space<vmem>>, vector<1x384xf32>
    %4 = vector.broadcast %3 : vector<1x384xf32> to vector<8x384xf32>
    %5 = arith.addf %2, %4 : vector<8x384xf32>
    %6 = vector.extract_strided_slice %5 {offsets = [0, 0], sizes = [8, 128], strides = [1, 1]} : vector<8x384xf32> to vector<8x128xf32>
    %7 = vector.extract_strided_slice %5 {offsets = [0, 128], sizes = [8, 128], strides = [1, 1]} : vector<8x384xf32> to vector<8x128xf32>
    %8 = vector.extract_strided_slice %5 {offsets = [0, 256], sizes = [8, 128], strides = [1, 1]} : vector<8x384xf32> to vector<8x128xf32>
    %cst_5 = arith.constant dense<0.000000e+00> : vector<8x8xf32>
    %9 = tpu.matmul %6, %7, %cst_5 {dimension_numbers = #tpu.dot_dimension_numbers<[1], [1], [0], [0], [0, 0, 1, 0], [], []>} : vector<8x128xf32>, vector<8x128xf32>, vector<8x8xf32> -> vector<8x8xf32>
    %cst_6 = arith.constant dense<0xFF800000> : vector<8xf32>
    %10 = vector.multi_reduction <maximumf>, %9, %cst_6 [1] : vector<8x8xf32> to vector<8xf32>
    %11 = vector.shape_cast %10 : vector<8xf32> to vector<8x1xf32>
    %12 = vector.broadcast %11 : vector<8x1xf32> to vector<8x8xf32>
    %13 = arith.subf %9, %12 : vector<8x8xf32>
    %14 = math.exp %13 : vector<8x8xf32>
    %cst_7 = arith.constant dense<0.000000e+00> : vector<8xf32>
    %15 = vector.multi_reduction <add>, %14, %cst_7 [1] : vector<8x8xf32> to vector<8xf32>
    %16 = vector.shape_cast %15 : vector<8xf32> to vector<8x1xf32>
    %cst_8 = arith.constant dense<0.000000e+00> : vector<8x128xf32>
    %17 = tpu.matmul %14, %8, %cst_8 {dimension_numbers = #tpu.dot_dimension_numbers<[1], [0], [0], [1], [0, 0, 1, 1], [], []>} : vector<8x8xf32>, vector<8x128xf32>, vector<8x128xf32> -> vector<8x128xf32>
    %18 = tpu.reciprocal %16 {approx = true} : vector<8x1xf32> -> vector<8x1xf32>
    %19 = arith.mulf %16, %18 : vector<8x1xf32>
    %cst_9 = arith.constant 2.000000e+00 : f32
    %20 = vector.broadcast %cst_9 : f32 to vector<8x1xf32>
    %21 = arith.subf %20, %19 : vector<8x1xf32>
    %22 = arith.mulf %18, %21 : vector<8x1xf32>
    %cst_10 = arith.constant 2.500000e-01 : f32
    %23 = vector.broadcast %cst_10 : f32 to vector<8x1xf32>
    %24 = arith.mulf %23, %22 : vector<8x1xf32>
    %25 = vector.broadcast %24 : vector<8x1xf32> to vector<8x128xf32>
    %26 = arith.mulf %17, %25 : vector<8x128xf32>
    %c0_11 = arith.constant 0 : index
    %c0_12 = arith.constant 0 : index
    %27 = vector.load %arg3[%c0_11, %c0_12] : memref<8x128xf32, #tpu.memory_space<vmem>>, vector<8x128xf32>
    tpu.vector_store %arg3[%c0_11, %c0_12], %26 {strides = array<i32>} : memref<8x128xf32, #tpu.memory_space<vmem>>, vector<8x128xf32>,
    return
  }
}

</mosaic_0001>

<bundles_post_ra>
// kernel: apply.1
= control target key start
LH: loop header
LB: loop body
LE: loop exit
PB: predicated region body
PF: predicated region fallthrough
CT: control target
= control target key end

     0   :  { %8 = vsyncpa [#allocation3], 0  ;;  %s605_s0 = inlined_call_operand.hbm [shape: f32[8,32], index: 0, kind: input, shape index: {}]   ;;  %s606_s1 = inlined_call_operand.hbm [shape: f32[32,384], index: 1, kind: input, shape index: {}]   ;;  %s607_s2 = inlined_call_operand.vmem [shape: f32[1,384], index: 2, kind: input, shape index: {}]   ;;  %s608_s3 = inlined_call_operand.hbm [shape: f32[8,128], index: 3, kind: output, shape index: {}]  }
   0x1   :  { %9 = vsyncpa [#allocation6], 0 }
   0x2   :  { %10 = vsyncpa [#allocation4], 0  ;;  %s523_s12 = smov [#allocation2]   ;;  %s524_s14 = smov [#allocation5]  }
   0x3   :  { %s17_s13 = sshll.u32 %s523_s12, 4  ;;  %s26_s15 = sshll.u32 %s524_s14, 4  ;;  %s18_s13 = int_to_ptr.vmem [resolvable:$true] %s17_s13  ;;  %s551_s15 = int_to_ptr.vmem [resolvable:$true] %s26_s15 }
   0x4   :  { %s451_s18 = scalar_lea.hbm %s605_s0, 128 }
   0x5   :  { %p452_p0 = scmp.ne.s32.totalorder %s605_s0, %s451_s18  ;;  %p455_p1 = scmp.lt.u32.totalorder %s451_s18, %s605_s0 }
   0x7   :  { %p457_p2 = pnand %p455_p1, %p452_p0 }
   0x9   :  { %460 = shalt.err (!%p457_p2)
}
   0xa   :  { %s461_s23 = scalar_lea.vmem %s18_s13, 128  ;;  %p466_p4 = scmp.lt.s32.totalorder %s18_s13, %s18_s13 }
   0xb   :  { %p462_p3 = scmp.ne.s32.totalorder %s18_s13, %s461_s23  ;;  %p467_p5 = scmp.lt.s32.totalorder %s461_s23, %s461_s23 }
   0xd   :  { %p468_p6 = por %p467_p5, %p466_p4 }
   0xf   :  { %p469_p7 = pnand %p468_p6, %p462_p3 }
  0x11   :  { %472 = shalt.err (!%p469_p7)
}
  0x12   :  { %20 = dma.hbm_to_vmem [thread:$0]  %s605_s0, 128, %s18_s13, [#allocation3]  }
  0x13   :  { %s473_s28 = scalar_lea.hbm %s606_s1, 1536 }
  0x14   :  { %p474_p8 = scmp.ne.s32.totalorder %s606_s1, %s473_s28  ;;  %p477_p9 = scmp.lt.u32.totalorder %s473_s28, %s606_s1 }
  0x16   :  { %p479_p10 = pnand %p477_p9, %p474_p8 }
  0x18   :  { %482 = shalt.err (!%p479_p10)
}
  0x19   :  { %s483_s6 = scalar_lea.vmem %s551_s15, 1536  ;;  %p488_p12 = scmp.lt.s32.totalorder %s551_s15, %s551_s15 }
  0x1a   :  { %p484_p11 = scmp.ne.s32.totalorder %s551_s15, %s483_s6  ;;  %p489_p13 = scmp.lt.s32.totalorder %s483_s6, %s483_s6 }
  0x1c   :  { %p490_p0 = por %p489_p13, %p488_p12 }
  0x1e   :  { %p491_p1 = pnand %p490_p0, %p484_p11 }
  0x20   :  { %494 = shalt.err (!%p491_p1)
}
  0x21   :  { %s525_s0 = smov 384   ;;  %s526_s7 = smov 24  }
  0x22   :  { %32 = dma.hbm_to_vmem [thread:$0]  %s606_s1, 1536, %s551_s15, [#allocation6], %s525_s0, %s525_s0, %s526_s7  }
  0x23   :  { %517 = dma.done.wait [#allocation3], 128  }
  0x24   :  { %518 = vsyncadd [#allocation3], 4294967168 }
  0x25   :  { %519 = dma.done.wait [#allocation6], 1536  }
  0x26   :  { %520 = vsyncadd [#allocation6], 4294965760  ;;  %v527_v0 = vmov 0.0   ;;  %v43_v1 = vld [vmem:[#allocation5 + $0x8] sm:$0xff]  ;;  %v46_v2 = vld [vmem:[#allocation5 + $0x20] sm:$0xff]  ;;  %vm71_vm0 = vcmask 261120   ;;  %v56_v21 = vlaneseq }
  0x27   :  { %139 = vmatprep.mubr.f32.mxu0 %v527_v0  ;;  %v42_v3 = vld [vmem:[#allocation5] sm:$0xff]  ;;  %v425_v4 = vpack.c.bf16 %v46_v2, %v43_v1  ;;  %v45_v5 = vld [vmem:[#allocation5 + $0x18] sm:$0xff]  ;;  %v52_v7 = vld [vmem:[#allocation5 + $0x50] sm:$0xff]  ;;  %vm528_vm1 = vmmov 0   ;;  %v529_v17 = vmov 0.0|0.0   ;;  %vm286_vm2 = vcmask 64512  }
  0x28   :  { %v49_v6 = vld [vmem:[#allocation5 + $0x38] sm:$0xff]  ;;  %v427_v8 = vpack.c.bf16 %v45_v5, %v42_v3  ;;  %v48_v10 = vld [vmem:[#allocation5 + $0x30] sm:$0xff]  ;;  %v51_v11 = vld [vmem:[#allocation5 + $0x48] sm:$0xff]  ;;  %412 = vmatprep.mubr.msk.f32.mxu1 %vm528_vm1, %v527_v0  ;;  %433 = vmatprep.subr.bf16.mxu1 %v529_v17  ;;  %v57_v22 = vshrl.u32 %v56_v21, 7 }
  0x29   :  { %v429_v9 = vpack.c.bf16 %v52_v7, %v49_v6  ;;  %426 = vmatprep.subr.bf16.mxu0 %v425_v4  ;;  %v431_v12 = vpack.c.bf16 %v51_v11, %v48_v10  ;;  %v41_v13 = vld [vmem:[#allocation2] sm:$0xff]  ;;  %v44_v14 = vld [vmem:[#allocation5 + $0x10] sm:$0xff]  ;;  %v47_v15 = vld [vmem:[#allocation5 + $0x28] sm:$0xff] }
  0x2a   :  { %428 = vmatpush1.bf16.msra.mxu0 %v427_v8  ;;  %v50_v16 = vld [vmem:[#allocation5 + $0x40] sm:$0xff]  ;;  %v434_v18 = vpack.c.bf16 %v47_v15, %v44_v14  ;;  %v53_v19 = vld [vmem:[#allocation5 + $0x58] sm:$0xff]  ;;  %v62_v23 = vsub.s32 1, %v57_v22  ;;  %v58_v25 = vsub.s32 0, %v57_v22  ;;  %v66_v35 = vsub.s32 2, %v57_v22 }
  0x2b   :  { %430 = vmatprep.subr.bf16.mxu0 %v429_v9  ;;  %v437_v20 = vpack.c.bf16 %v53_v19, %v50_v16  ;;  %v54_v24 = vld [vmem:[%s607_s2] sm:$0x7]  ;;  %s530_s2 = smov [#allocation7]  }
  0x2c   :  { %435 = vmatpush3.bf16.msra.mxu1 %v434_v18  ;;  %v63_v26 = vrot.slane %v54_v24, %v62_v23  ;;  %v59_v28 = vrot.slane %v54_v24, %v58_v25  ;;  %v67_v38 = vrot.slane %v54_v24, %v66_v35  ;;  %s382_s11 = sshll.u32 %s530_s2, 4  ;;  %s383_s11 = int_to_ptr.vmem [resolvable:$true] %s382_s11 }
  0x2d   :  { %436 = vmatprep.subr.bf16.mxu1 %v529_v17  ;;  %s495_s12 = scalar_lea.vmem %s383_s11, 128  ;;  %p500_p3 = scmp.lt.s32.totalorder %s383_s11, %s383_s11 }
  0x2e   :  { %432 = vmatpush1.bf16.msra.mxu0 %v431_v12  ;;  %p496_p2 = scmp.ne.s32.totalorder %s383_s11, %s495_s12  ;;  %p501_p4 = scmp.lt.s32.totalorder %s495_s12, %s495_s12 }
  0x2f   :  { %415 = vmatprep.subr.mxu0 %v527_v0 }
  0x30   :  { %438 = vmatpush3.bf16.msra.mxu1 %v437_v20  ;;  %p502_p5 = por %p501_p4, %p500_p3 }
  0x31   :  { %392 = vmatmul.mubr.msk.f32.vlgmr.msra.gmra.mrb[0].mxu0 %vm71_vm0, %v41_v13  ;;  %420 = vmatprep.subr.mxu1 %v527_v0 }
  0x32   :  { %417 = vmatprep.mubr.msk.f32.mxu0 %vm528_vm1, %v527_v0  ;;  %p503_p6 = pnand %p502_p5, %p496_p2 }
  0x33   :  { %413 = vmatmul.mubr.msk.f32.vlgmr.msra.gmra.mrb[0].mxu1 %vm71_vm0, %v41_v13 }
  0x34   :  { %422 = vmatprep.mubr.msk.f32.mxu1 %vm528_vm1, %v527_v0 }
 0x104   :  { %v141_v27 = vpop.f32.mrb[0].mxu0 }
 0x105   :  { %v143_v29 = vpop.f32.mrb[1].mxu0  ;;  %v142_v31 = vadd.f32 %v141_v27, %v59_v28 }
 0x106   :  { %v144_v30 = vadd.f32 %v143_v29, %v63_v26  ;;  %v212_v36 = vpop.f32.mrb[0].mxu1 }
 0x107   :  { %v414_v37 = vpop.f32.mrb[1].mxu1  ;;  %v213_v39 = vadd.f32 %v212_v36, %v67_v38 }
 0x108   :  { %416 = vmatpush3.xpose.msra.mxu0 %v144_v30 }
 0x109   :  { %421 = vmatpush3.msra.mxu1 %v213_v39 }
 0x10b   :  { %418 = vmatmul.mubr.f32.vlgmr.msra.gmra.mrb[2].mxu0 %v142_v31 }
 0x1de   :  { %v282_v32 = vpop.f32.mrb[2].mxu0 }
 0x1df   :  { %v419_v33 = vpop.f32.mrb[3].mxu0  ;;  %v287_v34 = vsel %vm286_vm2, %v282_v32, -inf }
 0x1e0   :  { %288 = vmax.xlane.f32.xlu0 %v287_v34 }
 0x26d   :  { %v289_v40 = vpop.xlane.xlu0 %288 }
 0x26e   :  { %v290_v41 = vsub.f32 %v282_v32, %v289_v40 }
 0x270   :  { %v291_v42 = vmul.f32 1.442695, %v290_v41 }
 0x272   :  { %447 = vpow2.f32 %v291_v42 }
 0x27c   :  { %v448_v43 = vpop.eup %447 }
 0x27d   :  { %423 = vmatmul.mubr.msk.f32.vlgmr.msra.gmra.mrb[2].mxu1 %vm286_vm2, %v448_v43  ;;  %v293_v44 = vsel %vm286_vm2, %v448_v43, 0.0 }
 0x27e   :  { %294 = vadd.xlane.f32.xlu0 %v293_v44 }
 0x30b   :  { %v295_v45 = vpop.xlane.xlu0 %294 }
 0x30c   :  { %449 = vrcp.f32 %v295_v45 }
 0x316   :  { %v450_v46 = vpop.eup %449 }
 0x317   :  { %v370_v47 = vmul.f32 %v450_v46, %v295_v45 }
 0x319   :  { %v371_v48 = vsub.f32 2.0, %v370_v47 }
 0x31b   :  { %v372_v49 = vmul.f32 %v450_v46, %v371_v48 }
 0x31d   :  { %v373_v50 = vmul.f32 0.25, %v372_v49 }
 0x350   :  { %v365_v51 = vpop.f32.mrb[2].mxu1 }
 0x351   :  { %v374_v52 = vmul.f32 %v373_v50, %v365_v51  ;;  %v424_v53 = vpop.f32.mrb[3].mxu1 }
 0x353   :  { %375 = vst [vmem:[#allocation7] sm:$0xff] %v374_v52 }
 0x354   :  { %506 = shalt.err (!%p503_p6)
}
 0x355   :  { %s507_s15 = scalar_lea.hbm %s608_s3, 128 }
 0x356   :  { %p508_p7 = scmp.ne.s32.totalorder %s608_s3, %s507_s15  ;;  %p511_p8 = scmp.lt.u32.totalorder %s507_s15, %s608_s3 }
 0x358   :  { %p513_p9 = pnand %p511_p8, %p508_p7 }
 0x35a   :  { %516 = shalt.err (!%p513_p9)
}
 0x35b   :  { %385 = dma.vmem_to_hbm [thread:$0]  %s383_s11, 128, %s608_s3, [#allocation4]  }
 0x35c   :  { %521 = dma.done.wait [#allocation4], 128  }
 0x35d   :  { %522 = vsyncadd [#allocation4], 4294967168 }
 0x35e   :  { %389 = vsyncpa [#allocation3], 1 }
 0x35f   :  { %390 = vsyncpa [#allocation6], 1 }
 0x360   :  { %391 = vsyncpa [#allocation4], 1 }

</bundles_post_ra>
